<compile_context>
chip_gen: v6e
topology: v6e:2x2x1
jax: 0.10.0
libtpu: 0.0.40
codegen_flags: <defaults>
</compile_context>

<pallas_src>
import functools

import jax
import jax.numpy as jnp
from jax import lax
from jax.experimental import pallas as pl
from jax.experimental.pallas import tpu as pltpu


def _rmsnorm_kernel(x_ref, scale_ref, o_ref, *, inv_d, eps, orig_dtype):
    # x_ref: (1, D, tT)   scale_ref: (D, 1)   o_ref: (1, D, tT)
    x = x_ref[...].astype(jnp.float32)                       # x.float()
    # Reduce over D (sublane axis); sum * (1/D) with static D.
    ms = jnp.sum(x * x, axis=1, keepdims=True) * inv_d        # (1, 1, tT)
    inv = lax.rsqrt(ms + eps)                                  # EUP rsqrt (free slot)
    normed = (x * inv).astype(orig_dtype)                      # .to(x.dtype)
    scale = scale_ref[...][None, :, :]                         # (1, D, 1): sublane-aligned
    o_ref[...] = (normed * scale).astype(o_ref.dtype)


def _vmem_capacity_bytes() -> int:
    """Physical VMEM of the current chip; conservative (v7x) fallback."""
    try:
        return int(pltpu.get_tpu_info().vmem_capacity_bytes)
    except Exception:
        return 64 << 20


def _working_set_bytes(D: int, tT: int, in_itemsize: int, out_itemsize: int) -> int:
    # Double-buffered x + out blocks, plus ~2 f32-sized temporaries the kernel
    # body materializes (x.astype(f32) / x*x / normed).
    return 2 * D * tT * (in_itemsize + out_itemsize) + 2 * D * tT * 4


def _choose_time_tile(T: int, D: int, in_itemsize: int, out_itemsize: int,
                      B: int, budget: int):
    """Pick a lane-dense tile width tT along T (no host-side padding)."""
    fits = lambda t: _working_set_bytes(D, t, in_itemsize, out_itemsize) <= budget

    if T <= 128:
        # Single full-T block; legal because the block dim equals the array dim.
        tT = T
    else:
        candidates = (2048, 1024, 512, 256, 128)
        tT = None
        # (a) Whole-T block: zero waste, one long contiguous DMA per row.
        if fits(T):
            tT = T
        # (b) Largest lane-aligned tile that divides T exactly (no ragged tail).
        if tT is None:
            for c in candidates:
                if c <= T and T % c == 0 and fits(c):
                    tT = c
                    break
        # (c) Largest lane-aligned tile that fits; ragged tail is masked in-kernel.
        if tT is None:
            for c in candidates:
                if c <= T and fits(c):
                    tT = c
                    break
        if tT is None:  # huge-D last resort; vmem_limit is raised to cover it.
            tT = 128

    num_t = pl.cdiv(T, tT)

    # v7x megacore: guarantee >= 2 grid steps when possible so both TensorCores
    # get work (pure memory-bound op => 2x bandwidth).  No-op on v5e/v6e.
    if B * num_t < 2 and T > 128:
        tT = max(128, ((pl.cdiv(T, 2) + 127) // 128) * 128)
        num_t = pl.cdiv(T, tT)
    return tT, num_t


def rmsnorm(x: jax.Array, scale: jax.Array, eps: float = 1e-6) -> jax.Array:
    """x: [B, D, T], scale: [D]."""
    B, D, T = x.shape
    out_dtype = jnp.promote_types(x.dtype, scale.dtype)  # matches torch promotion
    in_itemsize = jnp.dtype(x.dtype).itemsize
    out_itemsize = jnp.dtype(out_dtype).itemsize

    # Per-generation VMEM budgeting: leave headroom under the physical cap
    # (v7x: 64 MiB, v5e/v6e: 128 MiB) and never rely on the scoped default.
    cap = _vmem_capacity_bytes()
    vmem_limit = min(cap - (8 << 20), 96 << 20)
    budget = int(0.8 * vmem_limit)

    tT, num_t = _choose_time_tile(T, D, in_itemsize, out_itemsize, B, budget)
    ws = _working_set_bytes(D, tT, in_itemsize, out_itemsize)
    vmem_limit = min(cap - (8 << 20), max(32 << 20, int(1.25 * ws)))

    scale_col = scale.reshape(D, 1)  # (D, 1): D on sublanes, matches x layout

    kernel = functools.partial(
        _rmsnorm_kernel, inv_d=1.0 / D, eps=eps, orig_dtype=x.dtype
    )

    cost = pl.CostEstimate(
        flops=4 * B * D * T,
        transcendentals=B * T,
        bytes_accessed=B * D * T * (in_itemsize + out_itemsize)
        + D * jnp.dtype(scale.dtype).itemsize,
    )

    out = pl.pallas_call(
        kernel,
        out_shape=jax.ShapeDtypeStruct((B, D, T), out_dtype),
        grid=(B, num_t),
        in_specs=[
            pl.BlockSpec((1, D, tT), lambda b, t: (b, 0, t)),
            pl.BlockSpec((D, 1), lambda b, t: (0, 0)),
        ],
        out_specs=pl.BlockSpec((1, D, tT), lambda b, t: (b, 0, t)),
        compiler_params=pltpu.CompilerParams(
            dimension_semantics=("parallel", "parallel"),
            vmem_limit_bytes=int(vmem_limit),
        ),
        cost_estimate=cost,
    )(x, scale_col)

    return out


def rmsnorm_ref(x, scale, eps=1e-6):
    xf = x.astype(jnp.float32)
    ms = jnp.mean(xf * xf, axis=1, keepdims=True)
    out = (xf * lax.rsqrt(ms + eps)).astype(x.dtype)
    return out * scale.reshape(1, -1, 1)


if __name__ == "__main__":
    key = jax.random.PRNGKey(0)
    k1, k2, k3 = jax.random.split(key, 3)

    # Small shape consistent with the module's [Batch, Dim, Time] layout.
    B, D, T = 2, 32, 16
    x_small = jax.random.normal(k1, (B, D, T), dtype=jnp.float32)
    scale_small = jnp.ones((D,), dtype=jnp.float32)  # Parameter(torch.ones(D))

    out_small = rmsnorm(x_small, scale_small)
    jax.block_until_ready(out_small)
    ref_small = rmsnorm_ref(x_small, scale_small)
    assert out_small.shape == (B, D, T)
    assert jnp.allclose(out_small, ref_small, atol=1e-5, rtol=1e-5)

    # Exercises the whole-T-block (single contiguous DMA) path.
    B2, D2, T2 = 2, 64, 384
    x_big = jax.random.normal(k2, (B2, D2, T2), dtype=jnp.float32)
    scale_big = 1.0 + 0.01 * jnp.arange(D2, dtype=jnp.float32)

    out_big = rmsnorm(x_big, scale_big)
    jax.block_until_ready(out_big)
    ref_big = rmsnorm_ref(x_big, scale_big)
    assert out_big.shape == (B2, D2, T2)
    assert jnp.allclose(out_big, ref_big, atol=1e-5, rtol=1e-5)

    # Exercises the ragged-tail (in-kernel masked) path and the megacore split
    # (B == 1 forces >= 2 time tiles).
    B3, D3, T3 = 1, 64, 300
    x_rag = jax.random.normal(k3, (B3, D3, T3), dtype=jnp.float32)
    scale_rag = 1.0 - 0.005 * jnp.arange(D3, dtype=jnp.float32)

    out_rag = rmsnorm(x_rag, scale_rag)
    jax.block_until_ready(out_rag)
    ref_rag = rmsnorm_ref(x_rag, scale_rag)
    assert out_rag.shape == (B3, D3, T3)
    assert jnp.allclose(out_rag, ref_rag, atol=1e-5, rtol=1e-5)

    print("KERNEL_OK")
</pallas_src>

<mosaic_0001>
module attributes {stable_mosaic.version = 11 : i64} {
  func.func @_rmsnorm_kernel(%arg0: i32, %arg1: i32, %arg2: memref<1x32x16xf32, #tpu.memory_space<vmem>>, %arg3: memref<32x1xf32, #tpu.memory_space<vmem>>, %arg4: memref<1x32x16xf32, #tpu.memory_space<vmem>>) attributes {dimension_semantics = [#tpu.dimension_semantics<parallel>, #tpu.dimension_semantics<parallel>], iteration_bounds = array<i64: 2, 1>, scalar_prefetch = 0 : i64, scratch_operands = 0 : i64, tpu.core_type = #tpu.core_type<tc>, window_params = [{transform_indices = @transform_0, window_bounds = array<i64: 1, 32, 16>}, {pipeline_mode = #tpu.pipeline_mode<synchronous>, transform_indices = @transform_1, window_bounds = array<i64: 32, 1>}, {transform_indices = @transform_2, window_bounds = array<i64: 1, 32, 16>}]} {
    %c0 = arith.constant 0 : index
    %c0_0 = arith.constant 0 : index
    %c0_1 = arith.constant 0 : index
    %0 = vector.load %arg2[%c0, %c0_0, %c0_1] : memref<1x32x16xf32, #tpu.memory_space<vmem>>, vector<1x32x16xf32>
    %1 = arith.mulf %0, %0 : vector<1x32x16xf32>
    %cst = arith.constant dense<0.000000e+00> : vector<1x16xf32>
    %2 = vector.multi_reduction <add>, %1, %cst [1] : vector<1x32x16xf32> to vector<1x16xf32>
    %3 = vector.shape_cast %2 : vector<1x16xf32> to vector<1x1x16xf32>
    %cst_2 = arith.constant 3.125000e-02 : f32
    %4 = vector.broadcast %cst_2 : f32 to vector<1x1x16xf32>
    %5 = arith.mulf %3, %4 : vector<1x1x16xf32>
    %cst_3 = arith.constant 9.99999997E-7 : f32
    %6 = vector.broadcast %cst_3 : f32 to vector<1x1x16xf32>
    %7 = arith.addf %5, %6 : vector<1x1x16xf32>
    %8 = math.rsqrt %7 : vector<1x1x16xf32>
    %9 = vector.broadcast %8 : vector<1x1x16xf32> to vector<1x32x16xf32>
    %10 = arith.mulf %0, %9 : vector<1x32x16xf32>
    %c0_4 = arith.constant 0 : index
    %c0_5 = arith.constant 0 : index
    %11 = vector.load %arg3[%c0_4, %c0_5] : memref<32x1xf32, #tpu.memory_space<vmem>>, vector<32x1xf32>
    %12 = vector.shape_cast %11 : vector<32x1xf32> to vector<1x32x1xf32>
    %13 = vector.broadcast %12 : vector<1x32x1xf32> to vector<1x32x16xf32>
    %14 = arith.mulf %10, %13 : vector<1x32x16xf32>
    %c0_6 = arith.constant 0 : index
    %c0_7 = arith.constant 0 : index
    %c0_8 = arith.constant 0 : index
    %15 = vector.load %arg4[%c0_6, %c0_7, %c0_8] : memref<1x32x16xf32, #tpu.memory_space<vmem>>, vector<1x32x16xf32>
    tpu.vector_store %arg4[%c0_6, %c0_7, %c0_8], %14 {strides = array<i32>} : memref<1x32x16xf32, #tpu.memory_space<vmem>>, vector<1x32x16xf32>,
    return
  }
  func.func @transform_0(%arg0: i32, %arg1: i32) -> (i32, i32, i32) {
    %c0_i32 = arith.constant 0 : i32
    %c0_i32_0 = arith.constant 0 : i32
    return %arg0, %c0_i32, %arg1 : i32, i32, i32
  }
  func.func @transform_1(%arg0: i32, %arg1: i32) -> (i32, i32) {
    %c0_i32 = arith.constant 0 : i32
    %c0_i32_0 = arith.constant 0 : i32
    %c0_i32_1 = arith.constant 0 : i32
    return %c0_i32, %c0_i32_0 : i32, i32
  }
  func.func @transform_2(%arg0: i32, %arg1: i32) -> (i32, i32, i32) {
    %c0_i32 = arith.constant 0 : i32
    %c0_i32_0 = arith.constant 0 : i32
    return %arg0, %c0_i32, %arg1 : i32, i32, i32
  }
}

</mosaic_0001>

<bundles_post_ra>
// kernel: tpu_custom_call.1
= control target key start
LH: loop header
LB: loop body
LE: loop exit
PB: predicated region body
PF: predicated region fallthrough
CT: control target
= control target key end

     0   :  { %s401_s9 = smov 0   ;;  %s403_s10 = smov 0   ;;  %s461_s0 = inlined_call_operand.vmem [shape: f32[2,32,16], index: 0, kind: input, shape index: {}]   ;;  %s462_s1 = inlined_call_operand.vmem [shape: f32[32,1], index: 1, kind: input, shape index: {}]   ;;  %s463_s2 = inlined_call_operand.vmem [shape: f32[2,32,16], index: 2, kind: output, shape index: {}]  }
   0x1   :  { %s405_s11 = smov 0  }
   0x2 LB: > { %s24_s12 = sadd.s32 1, %s379_s10  ;;  %p323_p0 = scmp.ge.s32.totalorder %s383_s11, 1  ;;  %s383_s11 = sphi %s405_s11, %s12_s11   ;;  %s379_s10 = sphi %s403_s10, %s465_s10   ;;  %s375_s9 = sphi %s401_s9, %s464_s9  }
   0x3   : > { %p26_p1 = scmp.ge.s32.totalorder %s24_s12, 2  ;;  %p131_p2 = scmp.lt.s32.totalorder %s383_s11, 3 }
   0x5   : > { %s467_s12 = smov (%p26_p1, %s24_s12), 0  ;;  %p132_p3 = pnand %p323_p0, %p131_p2 }
   0x6   : > { %p159_p4 = scmp.lt.s32.totalorder (!%p132_p3), %s375_s9, 1 }
   0x7   : > { %135 = sbr.rel (%p132_p3) target bundleno = 145 (0x91), region = 28 }
   0xc   : > { %v206_v0 = vld [vmem:[%s462_s1 + $0x10] sm:$0xff]  ;;  %v204_v1 = vld [vmem:[%s462_s1] sm:$0xff]  ;;  %v385_v2 = vmov 0   ;;  %v207_v3 = vld [vmem:[%s462_s1 + $0x18] sm:$0xff]  ;;  %s469_s9 = smov (!%p159_p4, %s375_s9), 1  ;;  %vm183_vm0 = vcmask 130048  }
   0xd   : > { %358 = vset.pattern.permute.xlu1 %v385_v2  ;;  %357 = vset.pattern.permute.xlu0 %v385_v2  ;;  %v205_v4 = vld [vmem:[%s462_s1 + $0x8] sm:$0xff]  ;;  %s330_s21 = sshll.u32 %s469_s9, 5 }
   0xe   : > { %220 = vperm.xlu1 %358, %v206_v0   ;;  %210 = vperm.xlu0 %357, %v204_v1   ;;  %s166_s24 = scalar_lea.vmem %s461_s0, %s330_s21  ;;  %s174_s27 = scalar_lea.vmem %s463_s2, %s330_s21 }
   0xf   : > { %v175_v5 = vld [vmem:[%s166_s24] sm:$0xff]  ;;  %v176_v6 = vld [vmem:[%s166_s24 + $0x8] sm:$0xff]  ;;  %v177_v9 = vld [vmem:[%s166_s24 + $0x10] sm:$0xff] }
  0x10   : > { %v179_v7 = vmul.f32 %v175_v5, %v175_v5  ;;  %v180_v8 = vmul.f32 %v176_v6, %v176_v6  ;;  %v181_v10 = vmul.f32 %v177_v9, %v177_v9  ;;  %v178_v13 = vld [vmem:[%s166_s24 + $0x18] sm:$0xff] }
  0x11   : > { %v182_v15 = vmul.f32 %v178_v13, %v178_v13 }
  0x12   : > { %225 = vperm.xlu1 %358, %v207_v3   ;;  %215 = vperm.xlu0 %357, %v205_v4   ;;  %v184_v11 = vsel %vm183_vm0, %v179_v7, 0.0  ;;  %v185_v12 = vsel %vm183_vm0, %v180_v8, 0.0  ;;  %v187_v16 = vsel %vm183_vm0, %v181_v10, 0.0 }
  0x13   : > { %v186_v14 = vadd.f32 %v185_v12, %v184_v11  ;;  %v189_v18 = vsel %vm183_vm0, %v182_v15, 0.0 }
  0x15   : > { %v188_v17 = vadd.f32 %v187_v16, %v186_v14 }
  0x17   : > { %v190_v19 = vadd.f32 %v189_v18, %v188_v17 }
  0x19   : > { %v191_v20 = vrot.slane %v190_v19, 4 }
  0x1b   : > { %v192_v21 = vadd.f32 %v191_v20, %v190_v19 }
  0x1d   : > { %v193_v22 = vrot.slane %v192_v21, 2 }
  0x1f   : > { %v194_v23 = vadd.f32 %v193_v22, %v192_v21 }
  0x21   : > { %v195_v24 = vrot.slane %v194_v23, 1 }
  0x23   : > { %v196_v25 = vadd.f32 %v195_v24, %v194_v23 }
  0x25   : > { %v197_v26 = vmul.f32 0.03125, %v196_v25 }
  0x27   : > { %v198_v27 = vadd.f32 1e-06, %v197_v26 }
  0x29   : > { %359 = vrsqrt.f32 %v198_v27 }
  0x36   : > { %v360_v28 = vpop.eup %359 }
  0x37   : > { %v202_v29 = vmul.f32 %v360_v28, %v177_v9  ;;  %v200_v30 = vmul.f32 %v360_v28, %v175_v5  ;;  %v203_v35 = vmul.f32 %v360_v28, %v178_v13  ;;  %v201_v36 = vmul.f32 %v360_v28, %v176_v6 }
  0x89   : > { %v221_v31 = vpop.permute.xlu1 %220  ;;  %v211_v32 = vpop.permute.xlu0 %210 }
  0x8a   : > { %v230_v33 = vmul.f32 %v221_v31, %v202_v29  ;;  %v228_v34 = vmul.f32 %v211_v32, %v200_v30 }
  0x8c   : > { %234 = vst.msk [vmem:[%s174_s27 + $0x10] sm:$0xff] %vm183_vm0, %v230_v33  ;;  %232 = vst.msk [vmem:[%s174_s27] sm:$0xff] %vm183_vm0, %v228_v34 }
  0x8d   : > { %v226_v37 = vpop.permute.xlu1 %225  ;;  %v216_v38 = vpop.permute.xlu0 %215 }
  0x8e   : > { %v231_v39 = vmul.f32 %v226_v37, %v203_v35  ;;  %v229_v40 = vmul.f32 %v216_v38, %v201_v36 }
  0x90   : > { %235 = vst.msk [vmem:[%s174_s27 + $0x18] sm:$0xff] %vm183_vm0, %v231_v39  ;;  %233 = vst.msk [vmem:[%s174_s27 + $0x8] sm:$0xff] %vm183_vm0, %v229_v40 }
  0x91 PF: > { %s12_s11 = sadd.s32 1, %s383_s11   ;;  %s464_s9 = smov %s379_s10 }
  0x92   : > { %p9_p5 = scmp.ge.s32.totalorder %s12_s11, 4   ;;  %s465_s10 = smov %s467_s12 }
  0x94   :  { %11 = sbr.rel (!%p9_p5) target bundleno = 2 (0x2), region = 58 }

</bundles_post_ra>
